<compile_context>
chip_gen: v7x
topology: tpu7x:2x2x1
jax: 0.10.0
libtpu: 0.0.40
codegen_flags: <defaults>
</compile_context>

<pallas_src>
import functools

import jax
import jax.numpy as jnp
from jax.experimental import pallas as pl
from jax.experimental.pallas import tpu as pltpu


# Below this per-channel slab size the XLA gather path wins (DMA issue/launch
# overhead dominates a copy this small on every generation).
_MIN_SLAB_BYTES = 32 * 1024


def _shuffle_dma_kernel(C, perm_ref, x_hbm, o_hbm, sems):
    """One grid step = one batch element: copy its C channel slabs HBM->HBM,
    source channel chosen by the prefetched permutation table (SMEM)."""
    n = pl.program_id(0)
    last = pl.num_programs(0) - 1
    slot = n % 2          # two semaphore banks -> DMAs overlap across steps
    prev = 1 - slot
    base = n * C          # rows of the (N*C, H*W) flattened views

    # Issue this step's C slab copies; all C stay in flight simultaneously.
    for c in range(C):
        pltpu.make_async_copy(
            x_hbm.at[base + perm_ref[c]],   # contiguous H*W slab, permuted channel
            o_hbm.at[base + c],
            sems.at[slot, c],
        ).start()

    # Wait for the previous step's copies (same slab size -> same byte count).
    @pl.when(n > 0)
    def _():
        for c in range(C):
            pltpu.make_async_copy(
                x_hbm.at[0], o_hbm.at[0], sems.at[prev, c]
            ).wait()

    # Final step: drain this step's own copies before the kernel exits.
    @pl.when(n == last)
    def _():
        for c in range(C):
            pltpu.make_async_copy(
                x_hbm.at[0], o_hbm.at[0], sems.at[slot, c]
            ).wait()


def shuffle_sample_forward(x, key, training=True, *, min_slab_bytes=_MIN_SLAB_BYTES):
    """Pallas implementation of shuffle_sample.forward.

    x:   (N, C, H, W) array, C must be 6 when training=True.
    key: jax PRNGKey used to draw the channel permutation.
    """
    if not training:
        return x

    N, C, H, W = x.shape
    assert C == 6, "shuffle_sample requires channel dim == 6 in training mode"

    # Deterministic random permutation of the 6 channels (replaces torch.randperm).
    perm = jax.random.permutation(key, C).astype(jnp.int32)

    itemsize = jnp.dtype(x.dtype).itemsize
    slab_bytes = H * W * itemsize
    total_bytes = x.size * itemsize

    # Tiny per-channel slabs: per-DMA overhead dwarfs the copy -> XLA gather.
    if slab_bytes < min_slab_bytes:
        return x[:, perm]

    # Free reshapes for contiguous NCHW: one fully-contiguous row per (n, c).
    x2 = x.reshape(N * C, H * W)

    grid_spec = pltpu.PrefetchScalarGridSpec(
        num_scalar_prefetch=1,                           # perm -> SMEM
        grid=(N,),
        in_specs=[pl.BlockSpec(memory_space=pl.ANY)],    # x stays in HBM
        out_specs=pl.BlockSpec(memory_space=pl.ANY),     # written only via DMA
        scratch_shapes=[pltpu.SemaphoreType.DMA((2, C))],
    )

    out = pl.pallas_call(
        functools.partial(_shuffle_dma_kernel, C),
        out_shape=jax.ShapeDtypeStruct((N * C, H * W), x.dtype),
        grid_spec=grid_spec,
        compiler_params=pltpu.CompilerParams(
            dimension_semantics=("arbitrary",),
        ),
        cost_estimate=pl.CostEstimate(
            flops=0,
            transcendentals=0,
            bytes_accessed=2 * total_bytes,
        ),
    )(perm, x2)

    return out.reshape(N, C, H, W)


if __name__ == "__main__":
    key = jax.random.PRNGKey(0)
    k_data, k_perm = jax.random.split(key)

    # Small shapes consistent with the module: channel dim must be 6.
    N, C, H, W = 2, 6, 16, 16
    x = jax.random.normal(k_data, (N, C, H, W), dtype=jnp.float32)

    # Force the Pallas DMA path even at this small size to exercise it.
    out = shuffle_sample_forward(x, k_perm, training=True, min_slab_bytes=0)
    out = jax.block_until_ready(out)

    # Verify against the pure-JAX reference (same permutation).
    perm = jax.random.permutation(k_perm, C).astype(jnp.int32)
    ref = x[:, perm]
    assert out.shape == x.shape
    assert jnp.allclose(out, ref), "Pallas shuffle does not match reference"

    # Default wrapper path (small-slab bypass) must agree too.
    out_small = jax.block_until_ready(shuffle_sample_forward(x, k_perm, training=True))
    assert jnp.allclose(out_small, ref)

    # Eval-mode path is identity.
    out_eval = jax.block_until_ready(shuffle_sample_forward(x, k_perm, training=False))
    assert jnp.allclose(out_eval, x)

    print("KERNEL_OK")
</pallas_src>

<mosaic_0001>
module attributes {stable_mosaic.version = 11 : i64} {
  func.func @_shuffle_dma_kernel(%arg0: i32, %arg1: memref<6xi32, #tpu.memory_space<smem>>, %arg2: memref<12x256xf32, #tpu.memory_space<any>>, %arg3: memref<12x256xf32, #tpu.memory_space<any>>, %arg4: memref<2x6x!tpu.dma_semaphore, #tpu.memory_space<semaphore_mem>>) attributes {dimension_semantics = [#tpu.dimension_semantics<arbitrary>], iteration_bounds = array<i64: 2>, scalar_prefetch = 1 : i64, scratch_operands = 1 : i64, tpu.core_type = #tpu.core_type<tc>, window_params = [{}, {}]} {
    %c2_i32 = arith.constant 2 : i32
    %c0_i32 = arith.constant 0 : i32
    %0 = arith.cmpi eq, %c2_i32, %c0_i32 : i32
    %c1_i32 = arith.constant 1 : i32
    %1 = arith.select %0, %c1_i32, %c2_i32 : i32
    %2 = arith.remsi %arg0, %1 : i32
    %c0_i32_0 = arith.constant 0 : i32
    %3 = arith.cmpi ne, %2, %c0_i32_0 : i32
    %c0_i32_1 = arith.constant 0 : i32
    %4 = arith.cmpi slt, %2, %c0_i32_1 : i32
    %c0_i32_2 = arith.constant 0 : i32
    %5 = arith.cmpi slt, %1, %c0_i32_2 : i32
    %6 = arith.xori %4, %5 : i1
    %7 = arith.andi %6, %3 : i1
    %8 = arith.addi %2, %1 : i32
    %9 = arith.select %7, %8, %2 : i32
    %c1_i32_3 = arith.constant 1 : i32
    %10 = arith.subi %c1_i32_3, %9 : i32
    %c6_i32 = arith.constant 6 : i32
    %11 = arith.muli %arg0, %c6_i32 : i32
    %c0 = arith.constant 0 : index
    %12 = memref.load %arg1[%c0] : memref<6xi32, #tpu.memory_space<smem>>
    %13 = arith.addi %11, %12 : i32
    %c0_i32_4 = arith.constant 0 : i32
    %14 = arith.addi %11, %c0_i32_4 : i32
    %c0_i32_5 = arith.constant 0 : i32
    %c0_i32_6 = arith.constant 0 : i32
    %15 = tpu.memref_slice %arg2[%13, %c0_i32_6] : memref<12x256xf32, #tpu.memory_space<any>> -> memref<1x256xf32, #tpu.memory_space<any>>
    %16 = tpu.memref_squeeze %15 : memref<1x256xf32, #tpu.memory_space<any>> -> memref<256xf32, #tpu.memory_space<any>>
    %c0_i32_7 = arith.constant 0 : i32
    %17 = tpu.memref_slice %arg3[%14, %c0_i32_7] : memref<12x256xf32, #tpu.memory_space<any>> -> memref<1x256xf32, #tpu.memory_space<any>>
    %18 = tpu.memref_squeeze %17 : memref<1x256xf32, #tpu.memory_space<any>> -> memref<256xf32, #tpu.memory_space<any>>
    %19 = tpu.memref_slice %arg4[%9, %c0_i32_5] : memref<2x6x!tpu.dma_semaphore, #tpu.memory_space<semaphore_mem>> -> memref<1x1x!tpu.dma_semaphore, #tpu.memory_space<semaphore_mem>>
    %20 = tpu.memref_squeeze %19 : memref<1x1x!tpu.dma_semaphore, #tpu.memory_space<semaphore_mem>> -> memref<!tpu.dma_semaphore, #tpu.memory_space<semaphore_mem>>
    tpu.enqueue_dma source(%16 : memref<256xf32, #tpu.memory_space<any>>) target(%18 : memref<256xf32, #tpu.memory_space<any>>) target_semaphore(%20 : memref<!tpu.dma_semaphore, #tpu.memory_space<semaphore_mem>>)
    %c1 = arith.constant 1 : index
    %21 = memref.load %arg1[%c1] : memref<6xi32, #tpu.memory_space<smem>>
    %22 = arith.addi %11, %21 : i32
    %c1_i32_8 = arith.constant 1 : i32
    %23 = arith.addi %11, %c1_i32_8 : i32
    %c1_i32_9 = arith.constant 1 : i32
    %c0_i32_10 = arith.constant 0 : i32
    %24 = tpu.memref_slice %arg2[%22, %c0_i32_10] : memref<12x256xf32, #tpu.memory_space<any>> -> memref<1x256xf32, #tpu.memory_space<any>>
    %25 = tpu.memref_squeeze %24 : memref<1x256xf32, #tpu.memory_space<any>> -> memref<256xf32, #tpu.memory_space<any>>
    %c0_i32_11 = arith.constant 0 : i32
    %26 = tpu.memref_slice %arg3[%23, %c0_i32_11] : memref<12x256xf32, #tpu.memory_space<any>> -> memref<1x256xf32, #tpu.memory_space<any>>
    %27 = tpu.memref_squeeze %26 : memref<1x256xf32, #tpu.memory_space<any>> -> memref<256xf32, #tpu.memory_space<any>>
    %28 = tpu.memref_slice %arg4[%9, %c1_i32_9] : memref<2x6x!tpu.dma_semaphore, #tpu.memory_space<semaphore_mem>> -> memref<1x1x!tpu.dma_semaphore, #tpu.memory_space<semaphore_mem>>
    %29 = tpu.memref_squeeze %28 : memref<1x1x!tpu.dma_semaphore, #tpu.memory_space<semaphore_mem>> -> memref<!tpu.dma_semaphore, #tpu.memory_space<semaphore_mem>>
    tpu.enqueue_dma source(%25 : memref<256xf32, #tpu.memory_space<any>>) target(%27 : memref<256xf32, #tpu.memory_space<any>>) target_semaphore(%29 : memref<!tpu.dma_semaphore, #tpu.memory_space<semaphore_mem>>)
    %c2 = arith.constant 2 : index
    %30 = memref.load %arg1[%c2] : memref<6xi32, #tpu.memory_space<smem>>
    %31 = arith.addi %11, %30 : i32
    %c2_i32_12 = arith.constant 2 : i32
    %32 = arith.addi %11, %c2_i32_12 : i32
    %c2_i32_13 = arith.constant 2 : i32
    %c0_i32_14 = arith.constant 0 : i32
    %33 = tpu.memref_slice %arg2[%31, %c0_i32_14] : memref<12x256xf32, #tpu.memory_space<any>> -> memref<1x256xf32, #tpu.memory_space<any>>
    %34 = tpu.memref_squeeze %33 : memref<1x256xf32, #tpu.memory_space<any>> -> memref<256xf32, #tpu.memory_space<any>>
    %c0_i32_15 = arith.constant 0 : i32
    %35 = tpu.memref_slice %arg3[%32, %c0_i32_15] : memref<12x256xf32, #tpu.memory_space<any>> -> memref<1x256xf32, #tpu.memory_space<any>>
    %36 = tpu.memref_squeeze %35 : memref<1x256xf32, #tpu.memory_space<any>> -> memref<256xf32, #tpu.memory_space<any>>
    %37 = tpu.memref_slice %arg4[%9, %c2_i32_13] : memref<2x6x!tpu.dma_semaphore, #tpu.memory_space<semaphore_mem>> -> memref<1x1x!tpu.dma_semaphore, #tpu.memory_space<semaphore_mem>>
    %38 = tpu.memref_squeeze %37 : memref<1x1x!tpu.dma_semaphore, #tpu.memory_space<semaphore_mem>> -> memref<!tpu.dma_semaphore, #tpu.memory_space<semaphore_mem>>
    tpu.enqueue_dma source(%34 : memref<256xf32, #tpu.memory_space<any>>) target(%36 : memref<256xf32, #tpu.memory_space<any>>) target_semaphore(%38 : memref<!tpu.dma_semaphore, #tpu.memory_space<semaphore_mem>>)
    %c3 = arith.constant 3 : index
    %39 = memref.load %arg1[%c3] : memref<6xi32, #tpu.memory_space<smem>>
    %40 = arith.addi %11, %39 : i32
    %c3_i32 = arith.constant 3 : i32
    %41 = arith.addi %11, %c3_i32 : i32
    %c3_i32_16 = arith.constant 3 : i32
    %c0_i32_17 = arith.constant 0 : i32
    %42 = tpu.memref_slice %arg2[%40, %c0_i32_17] : memref<12x256xf32, #tpu.memory_space<any>> -> memref<1x256xf32, #tpu.memory_space<any>>
    %43 = tpu.memref_squeeze %42 : memref<1x256xf32, #tpu.memory_space<any>> -> memref<256xf32, #tpu.memory_space<any>>
    %c0_i32_18 = arith.constant 0 : i32
    %44 = tpu.memref_slice %arg3[%41, %c0_i32_18] : memref<12x256xf32, #tpu.memory_space<any>> -> memref<1x256xf32, #tpu.memory_space<any>>
    %45 = tpu.memref_squeeze %44 : memref<1x256xf32, #tpu.memory_space<any>> -> memref<256xf32, #tpu.memory_space<any>>
    %46 = tpu.memref_slice %arg4[%9, %c3_i32_16] : memref<2x6x!tpu.dma_semaphore, #tpu.memory_space<semaphore_mem>> -> memref<1x1x!tpu.dma_semaphore, #tpu.memory_space<semaphore_mem>>
    %47 = tpu.memref_squeeze %46 : memref<1x1x!tpu.dma_semaphore, #tpu.memory_space<semaphore_mem>> -> memref<!tpu.dma_semaphore, #tpu.memory_space<semaphore_mem>>
    tpu.enqueue_dma source(%43 : memref<256xf32, #tpu.memory_space<any>>) target(%45 : memref<256xf32, #tpu.memory_space<any>>) target_semaphore(%47 : memref<!tpu.dma_semaphore, #tpu.memory_space<semaphore_mem>>)
    %c4 = arith.constant 4 : index
    %48 = memref.load %arg1[%c4] : memref<6xi32, #tpu.memory_space<smem>>
    %49 = arith.addi %11, %48 : i32
    %c4_i32 = arith.constant 4 : i32
    %50 = arith.addi %11, %c4_i32 : i32
    %c4_i32_19 = arith.constant 4 : i32
    %c0_i32_20 = arith.constant 0 : i32
    %51 = tpu.memref_slice %arg2[%49, %c0_i32_20] : memref<12x256xf32, #tpu.memory_space<any>> -> memref<1x256xf32, #tpu.memory_space<any>>
    %52 = tpu.memref_squeeze %51 : memref<1x256xf32, #tpu.memory_space<any>> -> memref<256xf32, #tpu.memory_space<any>>
    %c0_i32_21 = arith.constant 0 : i32
    %53 = tpu.memref_slice %arg3[%50, %c0_i32_21] : memref<12x256xf32, #tpu.memory_space<any>> -> memref<1x256xf32, #tpu.memory_space<any>>
    %54 = tpu.memref_squeeze %53 : memref<1x256xf32, #tpu.memory_space<any>> -> memref<256xf32, #tpu.memory_space<any>>
    %55 = tpu.memref_slice %arg4[%9, %c4_i32_19] : memref<2x6x!tpu.dma_semaphore, #tpu.memory_space<semaphore_mem>> -> memref<1x1x!tpu.dma_semaphore, #tpu.memory_space<semaphore_mem>>
    %56 = tpu.memref_squeeze %55 : memref<1x1x!tpu.dma_semaphore, #tpu.memory_space<semaphore_mem>> -> memref<!tpu.dma_semaphore, #tpu.memory_space<semaphore_mem>>
    tpu.enqueue_dma source(%52 : memref<256xf32, #tpu.memory_space<any>>) target(%54 : memref<256xf32, #tpu.memory_space<any>>) target_semaphore(%56 : memref<!tpu.dma_semaphore, #tpu.memory_space<semaphore_mem>>)
    %c5 = arith.constant 5 : index
    %57 = memref.load %arg1[%c5] : memref<6xi32, #tpu.memory_space<smem>>
    %58 = arith.addi %11, %57 : i32
    %c5_i32 = arith.constant 5 : i32
    %59 = arith.addi %11, %c5_i32 : i32
    %c5_i32_22 = arith.constant 5 : i32
    %c0_i32_23 = arith.constant 0 : i32
    %60 = tpu.memref_slice %arg2[%58, %c0_i32_23] : memref<12x256xf32, #tpu.memory_space<any>> -> memref<1x256xf32, #tpu.memory_space<any>>
    %61 = tpu.memref_squeeze %60 : memref<1x256xf32, #tpu.memory_space<any>> -> memref<256xf32, #tpu.memory_space<any>>
    %c0_i32_24 = arith.constant 0 : i32
    %62 = tpu.memref_slice %arg3[%59, %c0_i32_24] : memref<12x256xf32, #tpu.memory_space<any>> -> memref<1x256xf32, #tpu.memory_space<any>>
    %63 = tpu.memref_squeeze %62 : memref<1x256xf32, #tpu.memory_space<any>> -> memref<256xf32, #tpu.memory_space<any>>
    %64 = tpu.memref_slice %arg4[%9, %c5_i32_22] : memref<2x6x!tpu.dma_semaphore, #tpu.memory_space<semaphore_mem>> -> memref<1x1x!tpu.dma_semaphore, #tpu.memory_space<semaphore_mem>>
    %65 = tpu.memref_squeeze %64 : memref<1x1x!tpu.dma_semaphore, #tpu.memory_space<semaphore_mem>> -> memref<!tpu.dma_semaphore, #tpu.memory_space<semaphore_mem>>
    tpu.enqueue_dma source(%61 : memref<256xf32, #tpu.memory_space<any>>) target(%63 : memref<256xf32, #tpu.memory_space<any>>) target_semaphore(%65 : memref<!tpu.dma_semaphore, #tpu.memory_space<semaphore_mem>>)
    %c0_i32_25 = arith.constant 0 : i32
    %66 = arith.cmpi sgt, %arg0, %c0_i32_25 : i32
    %67 = arith.extui %66 : i1 to i32
    %c0_i32_26 = arith.constant 0 : i32
    %68 = arith.cmpi ne, %67, %c0_i32_26 : i32
    scf.if %68 {
      %c0_i32_29 = arith.constant 0 : i32
      %c0_i32_30 = arith.constant 0 : i32
      %c0_i32_31 = arith.constant 0 : i32
      %c0_i32_32 = arith.constant 0 : i32
      %72 = tpu.memref_slice %arg2[%c0_i32_29, %c0_i32_32] : memref<12x256xf32, #tpu.memory_space<any>> -> memref<1x256xf32, #tpu.memory_space<any>>
      %73 = tpu.memref_squeeze %72 : memref<1x256xf32, #tpu.memory_space<any>> -> memref<256xf32, #tpu.memory_space<any>>
      %c0_i32_33 = arith.constant 0 : i32
      %74 = tpu.memref_slice %arg3[%c0_i32_30, %c0_i32_33] : memref<12x256xf32, #tpu.memory_space<any>> -> memref<1x256xf32, #tpu.memory_space<any>>
      %75 = tpu.memref_squeeze %74 : memref<1x256xf32, #tpu.memory_space<any>> -> memref<256xf32, #tpu.memory_space<any>>
      %76 = tpu.memref_slice %arg4[%10, %c0_i32_31] : memref<2x6x!tpu.dma_semaphore, #tpu.memory_space<semaphore_mem>> -> memref<1x1x!tpu.dma_semaphore, #tpu.memory_space<semaphore_mem>>
      %77 = tpu.memref_squeeze %76 : memref<1x1x!tpu.dma_semaphore, #tpu.memory_space<semaphore_mem>> -> memref<!tpu.dma_semaphore, #tpu.memory_space<semaphore_mem>>
      tpu.wait_dma2 semaphore(%77 : memref<!tpu.dma_semaphore, #tpu.memory_space<semaphore_mem>>) src(%73 : memref<256xf32, #tpu.memory_space<any>>) dst(%75 : memref<256xf32, #tpu.memory_space<any>>)
      %c0_i32_34 = arith.constant 0 : i32
      %c0_i32_35 = arith.constant 0 : i32
      %c1_i32_36 = arith.constant 1 : i32
      %c0_i32_37 = arith.constant 0 : i32
      %78 = tpu.memref_slice %arg2[%c0_i32_34, %c0_i32_37] : memref<12x256xf32, #tpu.memory_space<any>> -> memref<1x256xf32, #tpu.memory_space<any>>
      %79 = tpu.memref_squeeze %78 : memref<1x256xf32, #tpu.memory_space<any>> -> memref<256xf32, #tpu.memory_space<any>>
      %c0_i32_38 = arith.constant 0 : i32
      %80 = tpu.memref_slice %arg3[%c0_i32_35, %c0_i32_38] : memref<12x256xf32, #tpu.memory_space<any>> -> memref<1x256xf32, #tpu.memory_space<any>>
      %81 = tpu.memref_squeeze %80 : memref<1x256xf32, #tpu.memory_space<any>> -> memref<256xf32, #tpu.memory_space<any>>
      %82 = tpu.memref_slice %arg4[%10, %c1_i32_36] : memref<2x6x!tpu.dma_semaphore, #tpu.memory_space<semaphore_mem>> -> memref<1x1x!tpu.dma_semaphore, #tpu.memory_space<semaphore_mem>>
      %83 = tpu.memref_squeeze %82 : memref<1x1x!tpu.dma_semaphore, #tpu.memory_space<semaphore_mem>> -> memref<!tpu.dma_semaphore, #tpu.memory_space<semaphore_mem>>
      tpu.wait_dma2 semaphore(%83 : memref<!tpu.dma_semaphore, #tpu.memory_space<semaphore_mem>>) src(%79 : memref<256xf32, #tpu.memory_space<any>>) dst(%81 : memref<256xf32, #tpu.memory_space<any>>)
      %c0_i32_39 = arith.constant 0 : i32
      %c0_i32_40 = arith.constant 0 : i32
      %c2_i32_41 = arith.constant 2 : i32
      %c0_i32_42 = arith.constant 0 : i32
      %84 = tpu.memref_slice %arg2[%c0_i32_39, %c0_i32_42] : memref<12x256xf32, #tpu.memory_space<any>> -> memref<1x256xf32, #tpu.memory_space<any>>
      %85 = tpu.memref_squeeze %84 : memref<1x256xf32, #tpu.memory_space<any>> -> memref<256xf32, #tpu.memory_space<any>>
      %c0_i32_43 = arith.constant 0 : i32
      %86 = tpu.memref_slice %arg3[%c0_i32_40, %c0_i32_43] : memref<12x256xf32, #tpu.memory_space<any>> -> memref<1x256xf32, #tpu.memory_space<any>>
      %87 = tpu.memref_squeeze %86 : memref<1x256xf32, #tpu.memory_space<any>> -> memref<256xf32, #tpu.memory_space<any>>
      %88 = tpu.memref_slice %arg4[%10, %c2_i32_41] : memref<2x6x!tpu.dma_semaphore, #tpu.memory_space<semaphore_mem>> -> memref<1x1x!tpu.dma_semaphore, #tpu.memory_space<semaphore_mem>>
      %89 = tpu.memref_squeeze %88 : memref<1x1x!tpu.dma_semaphore, #tpu.memory_space<semaphore_mem>> -> memref<!tpu.dma_semaphore, #tpu.memory_space<semaphore_mem>>
      tpu.wait_dma2 semaphore(%89 : memref<!tpu.dma_semaphore, #tpu.memory_space<semaphore_mem>>) src(%85 : memref<256xf32, #tpu.memory_space<any>>) dst(%87 : memref<256xf32, #tpu.memory_space<any>>)
      %c0_i32_44 = arith.constant 0 : i32
      %c0_i32_45 = arith.constant 0 : i32
      %c3_i32_46 = arith.constant 3 : i32
      %c0_i32_47 = arith.constant 0 : i32
      %90 = tpu.memref_slice %arg2[%c0_i32_44, %c0_i32_47] : memref<12x256xf32, #tpu.memory_space<any>> -> memref<1x256xf32, #tpu.memory_space<any>>
      %91 = tpu.memref_squeeze %90 : memref<1x256xf32, #tpu.memory_space<any>> -> memref<256xf32, #tpu.memory_space<any>>
      %c0_i32_48 = arith.constant 0 : i32
      %92 = tpu.memref_slice %arg3[%c0_i32_45, %c0_i32_48] : memref<12x256xf32, #tpu.memory_space<any>> -> memref<1x256xf32, #tpu.memory_space<any>>
      %93 = tpu.memref_squeeze %92 : memref<1x256xf32, #tpu.memory_space<any>> -> memref<256xf32, #tpu.memory_space<any>>
      %94 = tpu.memref_slice %arg4[%10, %c3_i32_46] : memref<2x6x!tpu.dma_semaphore, #tpu.memory_space<semaphore_mem>> -> memref<1x1x!tpu.dma_semaphore, #tpu.memory_space<semaphore_mem>>
      %95 = tpu.memref_squeeze %94 : memref<1x1x!tpu.dma_semaphore, #tpu.memory_space<semaphore_mem>> -> memref<!tpu.dma_semaphore, #tpu.memory_space<semaphore_mem>>
      tpu.wait_dma2 semaphore(%95 : memref<!tpu.dma_semaphore, #tpu.memory_space<semaphore_mem>>) src(%91 : memref<256xf32, #tpu.memory_space<any>>) dst(%93 : memref<256xf32, #tpu.memory_space<any>>)
      %c0_i32_49 = arith.constant 0 : i32
      %c0_i32_50 = arith.constant 0 : i32
      %c4_i32_51 = arith.constant 4 : i32
      %c0_i32_52 = arith.constant 0 : i32
      %96 = tpu.memref_slice %arg2[%c0_i32_49, %c0_i32_52] : memref<12x256xf32, #tpu.memory_space<any>> -> memref<1x256xf32, #tpu.memory_space<any>>
      %97 = tpu.memref_squeeze %96 : memref<1x256xf32, #tpu.memory_space<any>> -> memref<256xf32, #tpu.memory_space<any>>
      %c0_i32_53 = arith.constant 0 : i32
      %98 = tpu.memref_slice %arg3[%c0_i32_50, %c0_i32_53] : memref<12x256xf32, #tpu.memory_space<any>> -> memref<1x256xf32, #tpu.memory_space<any>>
      %99 = tpu.memref_squeeze %98 : memref<1x256xf32, #tpu.memory_space<any>> -> memref<256xf32, #tpu.memory_space<any>>
      %100 = tpu.memref_slice %arg4[%10, %c4_i32_51] : memref<2x6x!tpu.dma_semaphore, #tpu.memory_space<semaphore_mem>> -> memref<1x1x!tpu.dma_semaphore, #tpu.memory_space<semaphore_mem>>
      %101 = tpu.memref_squeeze %100 : memref<1x1x!tpu.dma_semaphore, #tpu.memory_space<semaphore_mem>> -> memref<!tpu.dma_semaphore, #tpu.memory_space<semaphore_mem>>
      tpu.wait_dma2 semaphore(%101 : memref<!tpu.dma_semaphore, #tpu.memory_space<semaphore_mem>>) src(%97 : memref<256xf32, #tpu.memory_space<any>>) dst(%99 : memref<256xf32, #tpu.memory_space<any>>)
      %c0_i32_54 = arith.constant 0 : i32
      %c0_i32_55 = arith.constant 0 : i32
      %c5_i32_56 = arith.constant 5 : i32
      %c0_i32_57 = arith.constant 0 : i32
      %102 = tpu.memref_slice %arg2[%c0_i32_54, %c0_i32_57] : memref<12x256xf32, #tpu.memory_space<any>> -> memref<1x256xf32, #tpu.memory_space<any>>
      %103 = tpu.memref_squeeze %102 : memref<1x256xf32, #tpu.memory_space<any>> -> memref<256xf32, #tpu.memory_space<any>>
      %c0_i32_58 = arith.constant 0 : i32
      %104 = tpu.memref_slice %arg3[%c0_i32_55, %c0_i32_58] : memref<12x256xf32, #tpu.memory_space<any>> -> memref<1x256xf32, #tpu.memory_space<any>>
      %105 = tpu.memref_squeeze %104 : memref<1x256xf32, #tpu.memory_space<any>> -> memref<256xf32, #tpu.memory_space<any>>
      %106 = tpu.memref_slice %arg4[%10, %c5_i32_56] : memref<2x6x!tpu.dma_semaphore, #tpu.memory_space<semaphore_mem>> -> memref<1x1x!tpu.dma_semaphore, #tpu.memory_space<semaphore_mem>>
      %107 = tpu.memref_squeeze %106 : memref<1x1x!tpu.dma_semaphore, #tpu.memory_space<semaphore_mem>> -> memref<!tpu.dma_semaphore, #tpu.memory_space<semaphore_mem>>
      tpu.wait_dma2 semaphore(%107 : memref<!tpu.dma_semaphore, #tpu.memory_space<semaphore_mem>>) src(%103 : memref<256xf32, #tpu.memory_space<any>>) dst(%105 : memref<256xf32, #tpu.memory_space<any>>)
    } else {
    }
    %c1_i32_27 = arith.constant 1 : i32
    %69 = arith.cmpi eq, %arg0, %c1_i32_27 : i32
    %70 = arith.extui %69 : i1 to i32
    %c0_i32_28 = arith.constant 0 : i32
    %71 = arith.cmpi ne, %70, %c0_i32_28 : i32
    scf.if %71 {
      %c0_i32_29 = arith.constant 0 : i32
      %c0_i32_30 = arith.constant 0 : i32
      %c0_i32_31 = arith.constant 0 : i32
      %c0_i32_32 = arith.constant 0 : i32
      %72 = tpu.memref_slice %arg2[%c0_i32_29, %c0_i32_32] : memref<12x256xf32, #tpu.memory_space<any>> -> memref<1x256xf32, #tpu.memory_space<any>>
      %73 = tpu.memref_squeeze %72 : memref<1x256xf32, #tpu.memory_space<any>> -> memref<256xf32, #tpu.memory_space<any>>
      %c0_i32_33 = arith.constant 0 : i32
      %74 = tpu.memref_slice %arg3[%c0_i32_30, %c0_i32_33] : memref<12x256xf32, #tpu.memory_space<any>> -> memref<1x256xf32, #tpu.memory_space<any>>
      %75 = tpu.memref_squeeze %74 : memref<1x256xf32, #tpu.memory_space<any>> -> memref<256xf32, #tpu.memory_space<any>>
      %76 = tpu.memref_slice %arg4[%9, %c0_i32_31] : memref<2x6x!tpu.dma_semaphore, #tpu.memory_space<semaphore_mem>> -> memref<1x1x!tpu.dma_semaphore, #tpu.memory_space<semaphore_mem>>
      %77 = tpu.memref_squeeze %76 : memref<1x1x!tpu.dma_semaphore, #tpu.memory_space<semaphore_mem>> -> memref<!tpu.dma_semaphore, #tpu.memory_space<semaphore_mem>>
      tpu.wait_dma2 semaphore(%77 : memref<!tpu.dma_semaphore, #tpu.memory_space<semaphore_mem>>) src(%73 : memref<256xf32, #tpu.memory_space<any>>) dst(%75 : memref<256xf32, #tpu.memory_space<any>>)
      %c0_i32_34 = arith.constant 0 : i32
      %c0_i32_35 = arith.constant 0 : i32
      %c1_i32_36 = arith.constant 1 : i32
      %c0_i32_37 = arith.constant 0 : i32
      %78 = tpu.memref_slice %arg2[%c0_i32_34, %c0_i32_37] : memref<12x256xf32, #tpu.memory_space<any>> -> memref<1x256xf32, #tpu.memory_space<any>>
      %79 = tpu.memref_squeeze %78 : memref<1x256xf32, #tpu.memory_space<any>> -> memref<256xf32, #tpu.memory_space<any>>
      %c0_i32_38 = arith.constant 0 : i32
      %80 = tpu.memref_slice %arg3[%c0_i32_35, %c0_i32_38] : memref<12x256xf32, #tpu.memory_space<any>> -> memref<1x256xf32, #tpu.memory_space<any>>
      %81 = tpu.memref_squeeze %80 : memref<1x256xf32, #tpu.memory_space<any>> -> memref<256xf32, #tpu.memory_space<any>>
      %82 = tpu.memref_slice %arg4[%9, %c1_i32_36] : memref<2x6x!tpu.dma_semaphore, #tpu.memory_space<semaphore_mem>> -> memref<1x1x!tpu.dma_semaphore, #tpu.memory_space<semaphore_mem>>
      %83 = tpu.memref_squeeze %82 : memref<1x1x!tpu.dma_semaphore, #tpu.memory_space<semaphore_mem>> -> memref<!tpu.dma_semaphore, #tpu.memory_space<semaphore_mem>>
      tpu.wait_dma2 semaphore(%83 : memref<!tpu.dma_semaphore, #tpu.memory_space<semaphore_mem>>) src(%79 : memref<256xf32, #tpu.memory_space<any>>) dst(%81 : memref<256xf32, #tpu.memory_space<any>>)
      %c0_i32_39 = arith.constant 0 : i32
      %c0_i32_40 = arith.constant 0 : i32
      %c2_i32_41 = arith.constant 2 : i32
      %c0_i32_42 = arith.constant 0 : i32
      %84 = tpu.memref_slice %arg2[%c0_i32_39, %c0_i32_42] : memref<12x256xf32, #tpu.memory_space<any>> -> memref<1x256xf32, #tpu.memory_space<any>>
      %85 = tpu.memref_squeeze %84 : memref<1x256xf32, #tpu.memory_space<any>> -> memref<256xf32, #tpu.memory_space<any>>
      %c0_i32_43 = arith.constant 0 : i32
      %86 = tpu.memref_slice %arg3[%c0_i32_40, %c0_i32_43] : memref<12x256xf32, #tpu.memory_space<any>> -> memref<1x256xf32, #tpu.memory_space<any>>
      %87 = tpu.memref_squeeze %86 : memref<1x256xf32, #tpu.memory_space<any>> -> memref<256xf32, #tpu.memory_space<any>>
      %88 = tpu.memref_slice %arg4[%9, %c2_i32_41] : memref<2x6x!tpu.dma_semaphore, #tpu.memory_space<semaphore_mem>> -> memref<1x1x!tpu.dma_semaphore, #tpu.memory_space<semaphore_mem>>
      %89 = tpu.memref_squeeze %88 : memref<1x1x!tpu.dma_semaphore, #tpu.memory_space<semaphore_mem>> -> memref<!tpu.dma_semaphore, #tpu.memory_space<semaphore_mem>>
      tpu.wait_dma2 semaphore(%89 : memref<!tpu.dma_semaphore, #tpu.memory_space<semaphore_mem>>) src(%85 : memref<256xf32, #tpu.memory_space<any>>) dst(%87 : memref<256xf32, #tpu.memory_space<any>>)
      %c0_i32_44 = arith.constant 0 : i32
      %c0_i32_45 = arith.constant 0 : i32
      %c3_i32_46 = arith.constant 3 : i32
      %c0_i32_47 = arith.constant 0 : i32
      %90 = tpu.memref_slice %arg2[%c0_i32_44, %c0_i32_47] : memref<12x256xf32, #tpu.memory_space<any>> -> memref<1x256xf32, #tpu.memory_space<any>>
      %91 = tpu.memref_squeeze %90 : memref<1x256xf32, #tpu.memory_space<any>> -> memref<256xf32, #tpu.memory_space<any>>
      %c0_i32_48 = arith.constant 0 : i32
      %92 = tpu.memref_slice %arg3[%c0_i32_45, %c0_i32_48] : memref<12x256xf32, #tpu.memory_space<any>> -> memref<1x256xf32, #tpu.memory_space<any>>
      %93 = tpu.memref_squeeze %92 : memref<1x256xf32, #tpu.memory_space<any>> -> memref<256xf32, #tpu.memory_space<any>>
      %94 = tpu.memref_slice %arg4[%9, %c3_i32_46] : memref<2x6x!tpu.dma_semaphore, #tpu.memory_space<semaphore_mem>> -> memref<1x1x!tpu.dma_semaphore, #tpu.memory_space<semaphore_mem>>
      %95 = tpu.memref_squeeze %94 : memref<1x1x!tpu.dma_semaphore, #tpu.memory_space<semaphore_mem>> -> memref<!tpu.dma_semaphore, #tpu.memory_space<semaphore_mem>>
      tpu.wait_dma2 semaphore(%95 : memref<!tpu.dma_semaphore, #tpu.memory_space<semaphore_mem>>) src(%91 : memref<256xf32, #tpu.memory_space<any>>) dst(%93 : memref<256xf32, #tpu.memory_space<any>>)
      %c0_i32_49 = arith.constant 0 : i32
      %c0_i32_50 = arith.constant 0 : i32
      %c4_i32_51 = arith.constant 4 : i32
      %c0_i32_52 = arith.constant 0 : i32
      %96 = tpu.memref_slice %arg2[%c0_i32_49, %c0_i32_52] : memref<12x256xf32, #tpu.memory_space<any>> -> memref<1x256xf32, #tpu.memory_space<any>>
      %97 = tpu.memref_squeeze %96 : memref<1x256xf32, #tpu.memory_space<any>> -> memref<256xf32, #tpu.memory_space<any>>
      %c0_i32_53 = arith.constant 0 : i32
      %98 = tpu.memref_slice %arg3[%c0_i32_50, %c0_i32_53] : memref<12x256xf32, #tpu.memory_space<any>> -> memref<1x256xf32, #tpu.memory_space<any>>
      %99 = tpu.memref_squeeze %98 : memref<1x256xf32, #tpu.memory_space<any>> -> memref<256xf32, #tpu.memory_space<any>>
      %100 = tpu.memref_slice %arg4[%9, %c4_i32_51] : memref<2x6x!tpu.dma_semaphore, #tpu.memory_space<semaphore_mem>> -> memref<1x1x!tpu.dma_semaphore, #tpu.memory_space<semaphore_mem>>
      %101 = tpu.memref_squeeze %100 : memref<1x1x!tpu.dma_semaphore, #tpu.memory_space<semaphore_mem>> -> memref<!tpu.dma_semaphore, #tpu.memory_space<semaphore_mem>>
      tpu.wait_dma2 semaphore(%101 : memref<!tpu.dma_semaphore, #tpu.memory_space<semaphore_mem>>) src(%97 : memref<256xf32, #tpu.memory_space<any>>) dst(%99 : memref<256xf32, #tpu.memory_space<any>>)
      %c0_i32_54 = arith.constant 0 : i32
      %c0_i32_55 = arith.constant 0 : i32
      %c5_i32_56 = arith.constant 5 : i32
      %c0_i32_57 = arith.constant 0 : i32
      %102 = tpu.memref_slice %arg2[%c0_i32_54, %c0_i32_57] : memref<12x256xf32, #tpu.memory_space<any>> -> memref<1x256xf32, #tpu.memory_space<any>>
      %103 = tpu.memref_squeeze %102 : memref<1x256xf32, #tpu.memory_space<any>> -> memref<256xf32, #tpu.memory_space<any>>
      %c0_i32_58 = arith.constant 0 : i32
      %104 = tpu.memref_slice %arg3[%c0_i32_55, %c0_i32_58] : memref<12x256xf32, #tpu.memory_space<any>> -> memref<1x256xf32, #tpu.memory_space<any>>
      %105 = tpu.memref_squeeze %104 : memref<1x256xf32, #tpu.memory_space<any>> -> memref<256xf32, #tpu.memory_space<any>>
      %106 = tpu.memref_slice %arg4[%9, %c5_i32_56] : memref<2x6x!tpu.dma_semaphore, #tpu.memory_space<semaphore_mem>> -> memref<1x1x!tpu.dma_semaphore, #tpu.memory_space<semaphore_mem>>
      %107 = tpu.memref_squeeze %106 : memref<1x1x!tpu.dma_semaphore, #tpu.memory_space<semaphore_mem>> -> memref<!tpu.dma_semaphore, #tpu.memory_space<semaphore_mem>>
      tpu.wait_dma2 semaphore(%107 : memref<!tpu.dma_semaphore, #tpu.memory_space<semaphore_mem>>) src(%103 : memref<256xf32, #tpu.memory_space<any>>) dst(%105 : memref<256xf32, #tpu.memory_space<any>>)
    } else {
    }
    return
  }
}

</mosaic_0001>

<bundles_post_ra>
// kernel: tpu_custom_call.1
= control target key start
LH: loop header
LB: loop body
LE: loop exit
PB: predicated region body
PF: predicated region fallthrough
CT: control target
= control target key end

     0   :  { %s797_s0 = inlined_call_operand.hbm [shape: s32[6], index: 0, kind: input, shape index: {}]   ;;  %s798_s1 = inlined_call_operand.hbm [shape: f32[12,256], index: 1, kind: input, shape index: {}]   ;;  %s799_s2 = inlined_call_operand.hbm [shape: f32[12,256], index: 2, kind: output, shape index: {}]  }
   0x1   :  { %s541_s11 = scalar_lea.hbm %s797_s0, 16 }
   0x2   :  { %p542_p0 = scmp.ne.s32.totalorder %s797_s0, %s541_s11  ;;  %p545_p1 = scmp.lt.u32.totalorder %s541_s11, %s797_s0 }
   0x4   :  { %p547_p2 = pnand %p545_p1, %p542_p0 }
   0x6   :  { %550 = shalt.err (!%p547_p2)  }
   0x7   :  { %s609_s16 = smov [#allocation4]  }
   0x8   :  { %8 = dma.hbm_to_smem %s797_s0, 16, %s609_s16, [#allocation3] }
   0x9   :  { %555 = dma.done.wait [#allocation3], 16 }
   0xa   :  { %556 = vsyncadd [#allocation3], 4294967280 }
   0xb   :  { %10 = sfence }
   0xc   :  { %s646_s19 = smov 0  }
   0xd LB: > { %p18_p3 = scmp.lt.s32.totalorder %s607_s19, 0  ;;  %s19_s20 = ssub.s32 0, %s607_s19  ;;  %s607_s19 = sphi %s646_s19, %s16_s19  }
   0xe   : > { %s461_s21 = smin.u32 %s607_s19, %s19_s20  ;;  %s655_s22 = smul.u32 6, %s607_s19 }
   0xf   : > { %s21_s0 = sand.u32 1, %s461_s21   ;;  %s32_s23 = sld [smem:[#allocation4]] }
  0x10   : > { %s22_s24 = ssub.s32 0, %s21_s0  ;;  %s40_s25 = sshrl.u32 %s655_s22, 3 }
  0x11   : > { %s803_s24 = smov (!%p18_p3, %s22_s24), %s21_s0  ;;  %s41_s26 = sand.u32 7, %s655_s22  }
  0x12   : > { %s466_s27 = sshll.u32 %s40_s25, 4  ;;  %p463_p4 = scmp.lt.s32.totalorder %s803_s24, 0 }
  0x13   : > { %s28_s28 = sadd.s32 2, %s803_s24  ;;  %s43_s29 = sadd.s32 %s466_s27, %s41_s26 }
  0x14   : > { %s805_s28 = smov (!%p463_p4, %s28_s28), %s803_s24  ;;  %s467_s3 = sshll.u32 %s43_s29, 4 }
  0x15   : > { %s33_s30 = sadd.s32 %s32_s23, %s655_s22  ;;  %s30_s4 = ssub.s32 1, %s805_s28 }
  0x16   : > { %s34_s5 = sshrl.u32 %s33_s30, 3  ;;  %s35_s6 = sand.u32 7, %s33_s30  }
  0x17   : > { %s464_s7 = sshll.u32 %s34_s5, 4  ;;  %s45_s11 = scalar_lea.hbm %s799_s2, %s467_s3 }
  0x18   : > { %s37_s8 = sadd.s32 %s464_s7, %s35_s6  ;;  %s46_s13 = smul.u32 6, %s805_s28 }
  0x19   : > { %s465_s12 = sshll.u32 %s37_s8, 4  ;;  %s610_s17 = smov 128  }
  0x1a   : > { %s39_s16 = scalar_lea.hbm %s798_s1, %s465_s12  ;;  %60 = sst [smem:[#allocation6]] %s610_s17 }
  0x1b   : > { %62 = sst [smem:[#allocation6 + $0x1]] %s610_s17  ;;  %s800_s18 = smov 1  }
  0x1c   : > { %64 = sst [smem:[#allocation6 + $0x2]] %s800_s18  ;;  %s669_s20 = scalar_lea.sflag [#allocation2], %s46_s13 }
  0x1d   : > { %s612_s21 = smov [#allocation5]   ;;  %s613_s0 = smov 0  }
  0x1e   : > { %66 = dma.general %s39_s16, 32, %s45_s11, %s669_s20, %s612_s21, [#allocation6], %s613_s0, 0  }
  0x1f   : > { %s468_s23 = sld [smem:[#allocation4 + $0x1]]  ;;  %96 = sst [smem:[#allocation8]] %s610_s17 }
  0x20   : > { %98 = sst [smem:[#allocation8 + $0x1]] %s610_s17  ;;  %s675_s24 = smul.u32 6, %s30_s4 }
  0x21   : > { %100 = sst [smem:[#allocation8 + $0x2]] %s800_s18  ;;  %s69_s25 = sadd.s32 1, %s655_s22 }
  0x22   : > { %s76_s26 = sshrl.u32 %s69_s25, 3  ;;  %s77_s27 = sand.u32 7, %s69_s25  }
  0x23   : > { %s471_s28 = sshll.u32 %s76_s26, 4  ;;  %s680_s30 = scalar_lea.sflag %s669_s20, 1 [#allocation2] }
  0x24   : > { %s79_s29 = sadd.s32 %s471_s28, %s77_s27  ;;  %s105_s13 = sadd.s32 2, %s655_s22 }
  0x25   : > { %s68_s3 = sadd.s32 %s468_s23, %s655_s22  ;;  %s472_s5 = sshll.u32 %s79_s29, 4 }
  0x26   : > { %s70_s6 = sshrl.u32 %s68_s3, 3  ;;  %s71_s7 = sand.u32 7, %s68_s3  }
  0x27   : > { %s469_s8 = sshll.u32 %s70_s6, 4  ;;  %s81_s4 = scalar_lea.hbm %s799_s2, %s472_s5 }
  0x28   : > { %s73_s11 = sadd.s32 %s469_s8, %s71_s7  ;;  %s112_s21 = sshrl.u32 %s105_s13, 3 }
  0x29   : > { %s470_s12 = sshll.u32 %s73_s11, 4  ;;  %s614_s23 = smov [#allocation7]  }
  0x2a   : > { %s75_s16 = scalar_lea.hbm %s798_s1, %s470_s12  ;;  %s113_s26 = sand.u32 7, %s105_s13  }
  0x2b   : > { %102 = dma.general %s75_s16, 32, %s81_s4, %s680_s30, %s614_s23, [#allocation8], %s613_s0, 0  }
  0x2c   : > { %s473_s25 = sld [smem:[#allocation4 + $0x2]]  ;;  %132 = sst [smem:[#allocation10]] %s610_s17 }
  0x2d   : > { %134 = sst [smem:[#allocation10 + $0x1]] %s610_s17  ;;  %s476_s27 = sshll.u32 %s112_s21, 4 }
  0x2e   : > { %136 = sst [smem:[#allocation10 + $0x2]] %s800_s18  ;;  %s115_s28 = sadd.s32 %s476_s27, %s113_s26 }
  0x2f   : > { %s696_s29 = scalar_lea.sflag %s669_s20, 2 [#allocation2]  ;;  %s477_s3 = sshll.u32 %s115_s28, 4 }
  0x30   : > { %s117_s7 = scalar_lea.hbm %s799_s2, %s477_s3  ;;  %s141_s8 = sadd.s32 3, %s655_s22 }
  0x31   : > { %s148_s10 = sshrl.u32 %s141_s8, 3  ;;  %s149_s13 = sand.u32 7, %s141_s8  }
  0x32   : > { %s104_s9 = sadd.s32 %s473_s25, %s655_s22  ;;  %s481_s15 = sshll.u32 %s148_s10, 4 }
  0x33   : > { %s106_s4 = sshrl.u32 %s104_s9, 3  ;;  %s107_s11 = sand.u32 7, %s104_s9  }
  0x34   : > { %s474_s12 = sshll.u32 %s106_s4, 4  ;;  %s151_s27 = sadd.s32 %s481_s15, %s149_s13 }
  0x35   : > { %s109_s14 = sadd.s32 %s474_s12, %s107_s11  ;;  %s615_s28 = smov [#allocation9]  }
  0x36   : > { %s475_s16 = sshll.u32 %s109_s14, 4  ;;  %s482_s3 = sshll.u32 %s151_s27, 4 }
  0x37   : > { %s111_s26 = scalar_lea.hbm %s798_s1, %s475_s16  ;;  %s177_s5 = sadd.s32 4, %s655_s22 }
  0x38   : > { %138 = dma.general %s111_s26, 32, %s117_s7, %s696_s29, %s615_s28, [#allocation10], %s613_s0, 0  }
  0x39   : > { %s478_s25 = sld [smem:[#allocation4 + $0x3]]  ;;  %168 = sst [smem:[#allocation12]] %s610_s17 }
  0x3a   : > { %170 = sst [smem:[#allocation12 + $0x1]] %s610_s17  ;;  %s153_s9 = scalar_lea.hbm %s799_s2, %s482_s3 }
  0x3b   : > { %172 = sst [smem:[#allocation12 + $0x2]] %s800_s18  ;;  %s716_s10 = scalar_lea.sflag %s669_s20, 3 [#allocation2] }
  0x3c   : > { %s184_s4 = sshrl.u32 %s177_s5, 3  ;;  %s185_s12 = sand.u32 7, %s177_s5  }
  0x3d   : > { %s486_s15 = sshll.u32 %s184_s4, 4  ;;  %s616_s3 = smov [#allocation11]  }
  0x3e   : > { %s187_s28 = sadd.s32 %s486_s15, %s185_s12  ;;  %s213_s6 = sadd.s32 5, %s655_s22 }
  0x3f   : > { %s140_s11 = sadd.s32 %s478_s25, %s655_s22  ;;  %s487_s5 = sshll.u32 %s187_s28, 4 }
  0x40   : > { %s142_s7 = sshrl.u32 %s140_s11, 3  ;;  %s143_s13 = sand.u32 7, %s140_s11  }
  0x41   : > { %s479_s14 = sshll.u32 %s142_s7, 4  ;;  %s729_s8 = scalar_lea.sflag %s669_s20, 4 [#allocation2] }
  0x42   : > { %s145_s16 = sadd.s32 %s479_s14, %s143_s13  ;;  %s189_s12 = scalar_lea.hbm %s799_s2, %s487_s5 }
  0x43   : > { %s480_s21 = sshll.u32 %s145_s16, 4  ;;  %s220_s13 = sshrl.u32 %s213_s6, 3 }
  0x44   : > { %s147_s27 = scalar_lea.hbm %s798_s1, %s480_s21  ;;  %p521_p5 = scmp.gt.s32.totalorder %s607_s19, 0 }
  0x45   : > { %174 = dma.general %s147_s27, 32, %s153_s9, %s716_s10, %s616_s3, [#allocation12], %s613_s0, 0  }
  0x46   : > { %s483_s25 = sld [smem:[#allocation4 + $0x4]]  ;;  %204 = sst [smem:[#allocation14]] %s610_s17 }
  0x47   : > { %206 = sst [smem:[#allocation14 + $0x1]] %s610_s17  ;;  %s221_s23 = sand.u32 7, %s213_s6  }
  0x48   : > { %208 = sst [smem:[#allocation14 + $0x2]] %s800_s18  ;;  %s491_s3 = sshll.u32 %s220_s13, 4 }
  0x49   : > { %s617_s18 = smov [#allocation13]   ;;  %s223_s4 = sadd.s32 %s491_s3, %s221_s23 }
  0x4a   : > { %s745_s11 = scalar_lea.sflag %s669_s20, 5 [#allocation2]  ;;  %s252_s23 = scalar_lea.sflag [#allocation2], %s675_s24 }
  0x4c   : > { %s176_s7 = sadd.s32 %s483_s25, %s655_s22  ;;  %s801_s25 = smov 1  }
  0x4d   : > { %s178_s14 = sshrl.u32 %s176_s7, 3  ;;  %s179_s9 = sand.u32 7, %s176_s7  }
  0x4e   : > { %s484_s15 = sshll.u32 %s178_s14, 4  ;;  %s492_s7 = sshll.u32 %s223_s4, 4 }
  0x4f   : > { %s181_s16 = sadd.s32 %s484_s15, %s179_s9 }
  0x50   : > { %s485_s21 = sshll.u32 %s181_s16, 4  ;;  %s225_s16 = scalar_lea.hbm %s799_s2, %s492_s7 }
  0x51   : > { %s183_s28 = scalar_lea.hbm %s798_s1, %s485_s21 }
  0x52   : > { %210 = dma.general %s183_s28, 32, %s189_s12, %s729_s8, %s617_s18, [#allocation14], %s613_s0, 0  }
  0x53   : > { %s488_s5 = sld [smem:[#allocation4 + $0x5]]  ;;  %240 = sst [smem:[#allocation16]] %s610_s17 }
  0x54   : > { %242 = sst [smem:[#allocation16 + $0x1]] %s610_s17  ;;  %s618_s28 = smov [#allocation15]  }
  0x55   : > { %244 = sst [smem:[#allocation16 + $0x2]] %s801_s25 }
  0x59   : > { %s212_s6 = sadd.s32 %s488_s5, %s655_s22 }
  0x5a   : > { %s214_s14 = sshrl.u32 %s212_s6, 3  ;;  %s215_s13 = sand.u32 7, %s212_s6  }
  0x5b   : > { %s489_s9 = sshll.u32 %s214_s14, 4 }
  0x5c   : > { %s217_s15 = sadd.s32 %s489_s9, %s215_s13 }
  0x5d   : > { %s490_s21 = sshll.u32 %s217_s15, 4 }
  0x5e   : > { %s219_s27 = scalar_lea.hbm %s798_s1, %s490_s21 }
  0x5f   : > { %246 = dma.general %s219_s27, 32, %s225_s16, %s745_s11, %s618_s28, [#allocation16], %s613_s0, 0  }
  0x60   : > { %558 = dma.done.wait (%p521_p5), %s252_s23, 32 }
  0x61   : > { %560 = vsyncadd (%p521_p5), %s252_s23, 4294967264  ;;  %s443_s22 = scalar_lea.sflag %s252_s23, 1 [#allocation2] }
  0x62   : > { %562 = dma.done.wait (%p521_p5), %s443_s22, 32 }
  0x63   : > { %564 = vsyncadd (%p521_p5), %s443_s22, 4294967264  ;;  %s446_s3 = scalar_lea.sflag %s252_s23, 2 [#allocation2] }
  0x64   : > { %566 = dma.done.wait (%p521_p5), %s446_s3, 32 }
  0x65   : > { %568 = vsyncadd (%p521_p5), %s446_s3, 4294967264  ;;  %s449_s0 = scalar_lea.sflag %s252_s23, 3 [#allocation2] }
  0x66   : > { %570 = dma.done.wait (%p521_p5), %s449_s0, 32 }
  0x67   : > { %572 = vsyncadd (%p521_p5), %s449_s0, 4294967264  ;;  %s452_s24 = scalar_lea.sflag %s252_s23, 4 [#allocation2] }
  0x68   : > { %574 = dma.done.wait (%p521_p5), %s452_s24, 32 }
  0x69   : > { %576 = vsyncadd (%p521_p5), %s452_s24, 4294967264  ;;  %s455_s5 = scalar_lea.sflag %s252_s23, 5 [#allocation2] }
  0x6a   : > { %578 = dma.done.wait (%p521_p5), %s455_s5, 32 }
  0x6b   : > { %580 = vsyncadd (%p521_p5), %s455_s5, 4294967264  ;;  %p522_p6 = scmp.eq.s32.totalorder %s607_s19, 1 }
  0x6d   : > { %582 = dma.done.wait (%p522_p6), %s669_s20, 32 }
  0x6e   : > { %584 = vsyncadd (%p522_p6), %s669_s20, 4294967264 }
  0x6f   : > { %586 = dma.done.wait (%p522_p6), %s680_s30, 32 }
  0x70   : > { %588 = vsyncadd (%p522_p6), %s680_s30, 4294967264 }
  0x71   : > { %590 = dma.done.wait (%p522_p6), %s696_s29, 32 }
  0x72   : > { %592 = vsyncadd (%p522_p6), %s696_s29, 4294967264 }
  0x73   : > { %594 = dma.done.wait (%p522_p6), %s716_s10, 32 }
  0x74   : > { %596 = vsyncadd (%p522_p6), %s716_s10, 4294967264 }
  0x75   : > { %598 = dma.done.wait (%p522_p6), %s729_s8, 32 }
  0x76   : > { %600 = vsyncadd (%p522_p6), %s729_s8, 4294967264 }
  0x77   : > { %602 = dma.done.wait (%p522_p6), %s745_s11, 32 }
  0x78   : > { %604 = vsyncadd (%p522_p6), %s745_s11, 4294967264  ;;  %s16_s19 = sadd.s32 1, %s607_s19  }
  0x79   : > { %p13_p7 = scmp.ge.s32.totalorder %s16_s19, 2  }
  0x7b   :  { %15 = sbr.rel (!%p13_p7) target bundleno = 13 (0xd), region = 74 }
  0x82   :  { %291 = vsyncmov [#allocation2] }
  0x85   :  { %s292_s20 = vpop.sfrf %291 }
  0x86   :  { %p495_p8 = scmp.ne.s32.totalorder %s292_s20, 0 }
  0x88   :  { %296 = shalt.err (%p495_p8)  }
  0x89   :  { %298 = vsyncmov [#allocation2 + $0x1] }
  0x8c   :  { %s299_s30 = vpop.sfrf %298 }
  0x8d   :  { %p496_p9 = scmp.ne.s32.totalorder %s299_s30, 0 }
  0x8f   :  { %303 = shalt.err (%p496_p9)  }
  0x90   :  { %305 = vsyncmov [#allocation2 + $0x2] }
  0x93   :  { %s306_s29 = vpop.sfrf %305 }
  0x94   :  { %p497_p10 = scmp.ne.s32.totalorder %s306_s29, 0 }
  0x96   :  { %310 = shalt.err (%p497_p10)  }
  0x97   :  { %312 = vsyncmov [#allocation2 + $0x3] }
  0x9a   :  { %s313_s10 = vpop.sfrf %312 }
  0x9b   :  { %p498_p11 = scmp.ne.s32.totalorder %s313_s10, 0 }
  0x9d   :  { %317 = shalt.err (%p498_p11)  }
  0x9e   :  { %319 = vsyncmov [#allocation2 + $0x4] }
  0xa1   :  { %s320_s8 = vpop.sfrf %319 }
  0xa2   :  { %p499_p12 = scmp.ne.s32.totalorder %s320_s8, 0 }
  0xa4   :  { %324 = shalt.err (%p499_p12)  }
  0xa5   :  { %326 = vsyncmov [#allocation2 + $0x5] }
  0xa8   :  { %s327_s1 = vpop.sfrf %326 }
  0xa9   :  { %p500_p13 = scmp.ne.s32.totalorder %s327_s1, 0 }
  0xab   :  { %331 = shalt.err (%p500_p13)  }
  0xac   :  { %333 = vsyncmov [#allocation2 + $0x6] }
  0xaf   :  { %s334_s2 = vpop.sfrf %333 }
  0xb0   :  { %p501_p0 = scmp.ne.s32.totalorder %s334_s2, 0 }
  0xb2   :  { %338 = shalt.err (%p501_p0)  }
  0xb3   :  { %340 = vsyncmov [#allocation2 + $0x7] }
  0xb6   :  { %s341_s19 = vpop.sfrf %340 }
  0xb7   :  { %p502_p1 = scmp.ne.s32.totalorder %s341_s19, 0 }
  0xb9   :  { %345 = shalt.err (%p502_p1)  }
  0xba   :  { %347 = vsyncmov [#allocation2 + $0x8] }
  0xbd   :  { %s348_s25 = vpop.sfrf %347 }
  0xbe   :  { %p503_p2 = scmp.ne.s32.totalorder %s348_s25, 0 }
  0xc0   :  { %352 = shalt.err (%p503_p2)  }
  0xc1   :  { %354 = vsyncmov [#allocation2 + $0x9] }
  0xc4   :  { %s355_s4 = vpop.sfrf %354 }
  0xc5   :  { %p504_p3 = scmp.ne.s32.totalorder %s355_s4, 0 }
  0xc7   :  { %359 = shalt.err (%p504_p3)  }
  0xc8   :  { %361 = vsyncmov [#allocation2 + $0xa] }
  0xcb   :  { %s362_s11 = vpop.sfrf %361 }
  0xcc   :  { %p505_p4 = scmp.ne.s32.totalorder %s362_s11, 0 }
  0xce   :  { %366 = shalt.err (%p505_p4)  }
  0xcf   :  { %368 = vsyncmov [#allocation2 + $0xb] }
  0xd2   :  { %s369_s6 = vpop.sfrf %368 }
  0xd3   :  { %p506_p5 = scmp.ne.s32.totalorder %s369_s6, 0 }
  0xd5   :  { %373 = shalt.err (%p506_p5)  }

</bundles_post_ra>
